<compile_context>
chip_gen: v7x
topology: tpu7x:2x2x1
jax: 0.10.0
libtpu: 0.0.40
codegen_flags: <defaults>
</compile_context>

<pallas_src>
import functools

import jax
import jax.numpy as jnp
from jax import lax
from jax.experimental import pallas as pl
from jax.experimental.pallas import tpu as pltpu


# ----------------------------------------------------------------------------
# Pallas kernel: forward pass for one (batch, time-tile) grid step.
# ----------------------------------------------------------------------------
def _mappingnet_kernel(xw_ref, wf_ref, bf_ref, we_ref, be_ref, out_ref,
                       *, layer, tile, t_out, D):
    """Shapes seen by the kernel:
         xw_ref : (tile + 6*layer, Kpad)  bf16  (first-conv im2col rows, K-padded)
         wf_ref : (Kpad, D)               bf16
         bf_ref : (1, D)                  f32
         we_ref : (layer, 3, D, D)        bf16  (per-tap encoder weights)
         be_ref : (layer, 1, D)           f32
         out_ref: (1, D)                  f32   (masked partial pooled sum)
    """
    ti = pl.program_id(1)

    # ---- first: Conv1d(Cin -> D, k=7) == one MXU matmul on pre-im2col rows --
    out = jnp.dot(xw_ref[...], wf_ref[...],
                  preferred_element_type=jnp.float32) + bf_ref[...]  # (win, D) f32

    # ---- encoders: LeakyReLU(0.1) -> Conv1d(k=3, dil=3) + residual ----------
    cur = tile + 6 * layer
    for i in range(layer):
        h = jnp.maximum(out, 0.1 * out)        # LeakyReLU(0.1), single VALU op
        h_bf = h.astype(jnp.bfloat16)          # cast once, before slicing
        new = cur - 6                          # k=3, dil=3 => -6 rows
        conv = be_ref[i]                       # (1, D) f32, broadcasts
        for j in range(3):                     # per-tap matmuls, f32 accumulation
            # NOTE: tap offsets 3*j are not 8-aligned -> XLU sublane shifts;
            # free filler while the MXU dominates (see perf review item 10).
            conv = conv + jnp.dot(h_bf[3 * j:3 * j + new, :], we_ref[i, j],
                                  preferred_element_type=jnp.float32)
        out = conv + out[3:3 + new, :]         # residual == out[:, :, 3:-3]
        cur = new

    # ---- masked partial pooled sum (pad rows past t_out on the last tile) ---
    valid = t_out - ti * tile
    rows = lax.broadcasted_iota(jnp.int32, (tile, D), 0)
    psum = jnp.sum(jnp.where(rows < valid, out, 0.0), axis=0, keepdims=True)
    out_ref[...] = psum.astype(out_ref.dtype)


# ----------------------------------------------------------------------------
# Wrapper: PyTorch-layout params/inputs in, (B, D, 1) out.
# ----------------------------------------------------------------------------
def mappingnet_pallas(x, w_first, b_first, w_enc, b_enc, layer, *, time_tile=512):
    """x: (B, coeff_nc, T); w_first: (D, coeff_nc, 7); w_enc: (layer, D, D, 3)."""
    B, Cin, T = x.shape
    D = w_first.shape[0]
    t1 = T - 6
    t_out = t1 - 6 * layer
    assert t_out >= 1, "sequence too short for this many layers"
    halo = 6 * layer

    # Time tile over the *output* rows (multiples of 8 preferred for sublanes).
    tile = max(1, min(time_tile, t_out))
    n_t = pl.cdiv(t_out, tile)
    win = tile + halo                                   # rows each step consumes

    # ---- wrapper-side layout plumbing (XLA): im2col + K-pad + halo windows --
    K = 7 * Cin
    Kpad = ((K + 127) // 128) * 128
    x_t = jnp.transpose(x, (0, 2, 1)).astype(jnp.bfloat16)              # (B, T, Cin)
    xc = jnp.concatenate([x_t[:, j:j + t1, :] for j in range(7)], -1)   # (B, t1, K)
    xc = jnp.pad(xc, ((0, 0), (0, n_t * tile + halo - t1), (0, Kpad - K)))
    # Overlapping time windows materialized once: (B, n_t, win, Kpad) bf16.
    xw = jnp.stack([xc[:, i * tile:i * tile + win, :] for i in range(n_t)], axis=1)

    wf = jnp.transpose(w_first, (2, 1, 0)).reshape(K, D)                 # (7*Cin, D)
    wf = jnp.pad(wf, ((0, Kpad - K), (0, 0))).astype(jnp.bfloat16)       # (Kpad, D)
    we = jnp.transpose(w_enc, (0, 3, 2, 1)).astype(jnp.bfloat16)         # (L,3,Din,Dout)
    bf = b_first.reshape(1, D).astype(jnp.float32)
    be = b_enc.reshape(layer, 1, D).astype(jnp.float32)

    kern = functools.partial(_mappingnet_kernel, layer=layer, tile=tile,
                             t_out=t_out, D=D)

    # Scheduler hint (weights counted once: they stay resident in VMEM).
    flops_step = 2 * win * Kpad * D
    cur = win
    for _ in range(layer):
        cur -= 6
        flops_step += 3 * 2 * cur * D * D
    flops = B * n_t * flops_step
    bytes_accessed = int(xw.size * 2 + wf.size * 2 + we.size * 2
                         + bf.size * 4 + be.size * 4 + B * n_t * D * 4)

    # VMEM budget: x window double-buffered, weights single-buffered, plus the
    # in-kernel f32/bf16 activation temporaries; capped below v7x's 64 MiB.
    block_bytes = (2 * win * Kpad * 2                        # xw block, 2 buffers
                   + Kpad * D * 2 + layer * 3 * D * D * 2    # weights, 1 buffer
                   + (layer + 1) * D * 4                     # biases
                   + win * D * (4 + 4 + 4 + 2)               # out/h/conv/h_bf temps
                   + 2 * D * 4)                              # out block
    vmem_limit = int(min(max(block_bytes + (16 << 20), 32 << 20), 56 << 20))

    resident = pl.Buffered(buffer_count=1)     # fetch once, no double buffering
    partial = pl.pallas_call(
        kern,
        out_shape=jax.ShapeDtypeStruct((B, n_t, 1, D), jnp.float32),
        grid=(B, n_t),
        in_specs=[
            pl.BlockSpec((None, None, win, Kpad), lambda b, t: (b, t, 0, 0)),
            pl.BlockSpec((Kpad, D), lambda b, t: (0, 0), pipeline_mode=resident),
            pl.BlockSpec((1, D), lambda b, t: (0, 0), pipeline_mode=resident),
            pl.BlockSpec((layer, 3, D, D), lambda b, t: (0, 0, 0, 0),
                         pipeline_mode=resident),
            pl.BlockSpec((layer, 1, D), lambda b, t: (0, 0, 0),
                         pipeline_mode=resident),
        ],
        out_specs=pl.BlockSpec((None, None, 1, D), lambda b, t: (b, t, 0, 0)),
        compiler_params=pltpu.CompilerParams(
            dimension_semantics=("parallel", "parallel"),   # B and time tiles
            vmem_limit_bytes=vmem_limit),
        cost_estimate=pl.CostEstimate(flops=flops, transcendentals=0,
                                      bytes_accessed=bytes_accessed),
    )(xw, wf, bf, we, be)

    pooled = jnp.sum(partial[:, :, 0, :], axis=1) / t_out    # mean over time
    return pooled[:, :, None]                                # (B, D, 1)


# ----------------------------------------------------------------------------
# Pure-JAX reference with matching numerics (bf16 MXU operands, f32 accum).
# ----------------------------------------------------------------------------
def mappingnet_ref(x, w_first, b_first, w_enc, b_enc, layer):
    dn = ("NCH", "OIH", "NCH")   # 1-D conv, NCT layout
    out = lax.conv_general_dilated(
        x.astype(jnp.bfloat16), w_first.astype(jnp.bfloat16),
        window_strides=(1,), padding="VALID", dimension_numbers=dn,
        preferred_element_type=jnp.float32)
    out = out + b_first[None, :, None]
    for i in range(layer):
        h = jnp.where(out > 0, out, 0.1 * out)
        c = lax.conv_general_dilated(
            h.astype(jnp.bfloat16), w_enc[i].astype(jnp.bfloat16),
            window_strides=(1,), padding="VALID", rhs_dilation=(3,),
            dimension_numbers=dn, preferred_element_type=jnp.float32)
        out = c + b_enc[i][None, :, None] + out[:, :, 3:-3]
    return jnp.mean(out, axis=2, keepdims=True)


if __name__ == "__main__":
    # Small, deterministic config consistent with MappingNet(coeff_nc, D, layer)
    B, coeff_nc, D, layer, T = 2, 8, 32, 2, 32   # t_out = 14

    key = jax.random.PRNGKey(0)
    k1, k2, k3, k4, k5 = jax.random.split(key, 5)
    w_first = jax.random.normal(k1, (D, coeff_nc, 7), jnp.float32) * 0.1
    b_first = jax.random.normal(k2, (D,), jnp.float32) * 0.1
    w_enc = jax.random.normal(k3, (layer, D, D, 3), jnp.float32) * 0.1
    b_enc = jax.random.normal(k4, (layer, D), jnp.float32) * 0.1
    x = jax.random.normal(k5, (B, coeff_nc, T), jnp.float32)

    ref = jax.block_until_ready(
        mappingnet_ref(x, w_first, b_first, w_enc, b_enc, layer))

    # Tiled path: time_tile=8 -> 2 time tiles, exercises halo + masked last tile.
    out_tiled = jax.block_until_ready(
        mappingnet_pallas(x, w_first, b_first, w_enc, b_enc, layer, time_tile=8))
    # Single-tile path: whole sequence in one grid step per batch element.
    out_full = jax.block_until_ready(
        mappingnet_pallas(x, w_first, b_first, w_enc, b_enc, layer))

    assert out_tiled.shape == (B, D, 1), out_tiled.shape
    assert out_full.shape == (B, D, 1), out_full.shape
    assert jnp.allclose(out_tiled, ref, atol=2e-3, rtol=2e-3), (
        float(jnp.max(jnp.abs(out_tiled - ref))))
    assert jnp.allclose(out_full, ref, atol=2e-3, rtol=2e-3), (
        float(jnp.max(jnp.abs(out_full - ref))))
    print("KERNEL_OK")
</pallas_src>

<mosaic_0001>
module attributes {stable_mosaic.version = 11 : i64} {
  func.func @_mappingnet_kernel(%arg0: i32, %arg1: i32, %arg2: memref<1x1x20x128xbf16, #tpu.memory_space<vmem>>, %arg3: memref<128x32xbf16, #tpu.memory_space<vmem>>, %arg4: memref<1x32xf32, #tpu.memory_space<vmem>>, %arg5: memref<2x3x32x32xbf16, #tpu.memory_space<vmem>>, %arg6: memref<2x1x32xf32, #tpu.memory_space<vmem>>, %arg7: memref<1x1x1x32xf32, #tpu.memory_space<vmem>>) attributes {dimension_semantics = [#tpu.dimension_semantics<parallel>, #tpu.dimension_semantics<parallel>], iteration_bounds = array<i64: 2, 2>, scalar_prefetch = 0 : i64, scratch_operands = 0 : i64, tpu.core_type = #tpu.core_type<tc>, window_params = [{transform_indices = @transform_0, window_bounds = array<i64: 1, 1, 20, 128>}, {pipeline_mode = #tpu.pipeline_mode<synchronous>, transform_indices = @transform_1, window_bounds = array<i64: 128, 32>}, {pipeline_mode = #tpu.pipeline_mode<synchronous>, transform_indices = @transform_2, window_bounds = array<i64: 1, 32>}, {pipeline_mode = #tpu.pipeline_mode<synchronous>, transform_indices = @transform_3, window_bounds = array<i64: 2, 3, 32, 32>}, {pipeline_mode = #tpu.pipeline_mode<synchronous>, transform_indices = @transform_4, window_bounds = array<i64: 2, 1, 32>}, {transform_indices = @transform_5, window_bounds = array<i64: 1, 1, 1, 32>}]} {
    %c0 = arith.constant 0 : index
    %c0_0 = arith.constant 0 : index
    %c0_1 = arith.constant 0 : index
    %c0_2 = arith.constant 0 : index
    %0 = vector.load %arg2[%c0, %c0_0, %c0_1, %c0_2] : memref<1x1x20x128xbf16, #tpu.memory_space<vmem>>, vector<1x1x20x128xbf16>
    %1 = vector.shape_cast %0 : vector<1x1x20x128xbf16> to vector<20x128xbf16>
    %c0_3 = arith.constant 0 : index
    %c0_4 = arith.constant 0 : index
    %2 = vector.load %arg3[%c0_3, %c0_4] : memref<128x32xbf16, #tpu.memory_space<vmem>>, vector<128x32xbf16>
    %cst = arith.constant dense<0.000000e+00> : vector<20x32xf32>
    %3 = tpu.matmul %1, %2, %cst {dimension_numbers = #tpu.dot_dimension_numbers<[1], [0], [0], [1], [0, 0, 1, 1], [], []>} : vector<20x128xbf16>, vector<128x32xbf16>, vector<20x32xf32> -> vector<20x32xf32>
    %c0_5 = arith.constant 0 : index
    %c0_6 = arith.constant 0 : index
    %4 = vector.load %arg4[%c0_5, %c0_6] : memref<1x32xf32, #tpu.memory_space<vmem>>, vector<1x32xf32>
    %5 = vector.broadcast %4 : vector<1x32xf32> to vector<20x32xf32>
    %6 = arith.addf %3, %5 : vector<20x32xf32>
    %cst_7 = arith.constant 1.000000e-01 : f32
    %7 = vector.broadcast %cst_7 : f32 to vector<20x32xf32>
    %8 = arith.mulf %7, %6 : vector<20x32xf32>
    %9 = arith.maximumf %6, %8 : vector<20x32xf32>
    %10 = arith.truncf %9 : vector<20x32xf32> to vector<20x32xbf16>
    %c0_8 = arith.constant 0 : index
    %c0_9 = arith.constant 0 : index
    %c0_10 = arith.constant 0 : index
    %11 = vector.load %arg6[%c0_8, %c0_9, %c0_10] : memref<2x1x32xf32, #tpu.memory_space<vmem>>, vector<1x1x32xf32>
    %12 = vector.shape_cast %11 : vector<1x1x32xf32> to vector<1x32xf32>
    %13 = vector.extract_strided_slice %10 {offsets = [0, 0], sizes = [14, 32], strides = [1, 1]} : vector<20x32xbf16> to vector<14x32xbf16>
    %c0_11 = arith.constant 0 : index
    %c0_12 = arith.constant 0 : index
    %c0_13 = arith.constant 0 : index
    %c0_14 = arith.constant 0 : index
    %14 = vector.load %arg5[%c0_11, %c0_12, %c0_13, %c0_14] : memref<2x3x32x32xbf16, #tpu.memory_space<vmem>>, vector<1x1x32x32xbf16>
    %15 = vector.shape_cast %14 : vector<1x1x32x32xbf16> to vector<32x32xbf16>
    %cst_15 = arith.constant dense<0.000000e+00> : vector<14x32xf32>
    %16 = tpu.matmul %13, %15, %cst_15 {dimension_numbers = #tpu.dot_dimension_numbers<[1], [0], [0], [1], [0, 0, 1, 1], [], []>} : vector<14x32xbf16>, vector<32x32xbf16>, vector<14x32xf32> -> vector<14x32xf32>
    %17 = vector.broadcast %12 : vector<1x32xf32> to vector<14x32xf32>
    %18 = arith.addf %17, %16 : vector<14x32xf32>
    %19 = vector.extract_strided_slice %10 {offsets = [3, 0], sizes = [14, 32], strides = [1, 1]} : vector<20x32xbf16> to vector<14x32xbf16>
    %c0_16 = arith.constant 0 : index
    %c1 = arith.constant 1 : index
    %c0_17 = arith.constant 0 : index
    %c0_18 = arith.constant 0 : index
    %20 = vector.load %arg5[%c0_16, %c1, %c0_17, %c0_18] : memref<2x3x32x32xbf16, #tpu.memory_space<vmem>>, vector<1x1x32x32xbf16>
    %21 = vector.shape_cast %20 : vector<1x1x32x32xbf16> to vector<32x32xbf16>
    %cst_19 = arith.constant dense<0.000000e+00> : vector<14x32xf32>
    %22 = tpu.matmul %19, %21, %cst_19 {dimension_numbers = #tpu.dot_dimension_numbers<[1], [0], [0], [1], [0, 0, 1, 1], [], []>} : vector<14x32xbf16>, vector<32x32xbf16>, vector<14x32xf32> -> vector<14x32xf32>
    %23 = arith.addf %18, %22 : vector<14x32xf32>
    %24 = vector.extract_strided_slice %10 {offsets = [6, 0], sizes = [14, 32], strides = [1, 1]} : vector<20x32xbf16> to vector<14x32xbf16>
    %c0_20 = arith.constant 0 : index
    %c2 = arith.constant 2 : index
    %c0_21 = arith.constant 0 : index
    %c0_22 = arith.constant 0 : index
    %25 = vector.load %arg5[%c0_20, %c2, %c0_21, %c0_22] : memref<2x3x32x32xbf16, #tpu.memory_space<vmem>>, vector<1x1x32x32xbf16>
    %26 = vector.shape_cast %25 : vector<1x1x32x32xbf16> to vector<32x32xbf16>
    %cst_23 = arith.constant dense<0.000000e+00> : vector<14x32xf32>
    %27 = tpu.matmul %24, %26, %cst_23 {dimension_numbers = #tpu.dot_dimension_numbers<[1], [0], [0], [1], [0, 0, 1, 1], [], []>} : vector<14x32xbf16>, vector<32x32xbf16>, vector<14x32xf32> -> vector<14x32xf32>
    %28 = arith.addf %23, %27 : vector<14x32xf32>
    %29 = vector.extract_strided_slice %6 {offsets = [3, 0], sizes = [14, 32], strides = [1, 1]} : vector<20x32xf32> to vector<14x32xf32>
    %30 = arith.addf %28, %29 : vector<14x32xf32>
    %cst_24 = arith.constant 1.000000e-01 : f32
    %31 = vector.broadcast %cst_24 : f32 to vector<14x32xf32>
    %32 = arith.mulf %31, %30 : vector<14x32xf32>
    %33 = arith.maximumf %30, %32 : vector<14x32xf32>
    %34 = arith.truncf %33 : vector<14x32xf32> to vector<14x32xbf16>
    %c1_25 = arith.constant 1 : index
    %c0_26 = arith.constant 0 : index
    %c0_27 = arith.constant 0 : index
    %35 = vector.load %arg6[%c1_25, %c0_26, %c0_27] : memref<2x1x32xf32, #tpu.memory_space<vmem>>, vector<1x1x32xf32>
    %36 = vector.shape_cast %35 : vector<1x1x32xf32> to vector<1x32xf32>
    %37 = vector.extract_strided_slice %34 {offsets = [0, 0], sizes = [8, 32], strides = [1, 1]} : vector<14x32xbf16> to vector<8x32xbf16>
    %c1_28 = arith.constant 1 : index
    %c0_29 = arith.constant 0 : index
    %c0_30 = arith.constant 0 : index
    %c0_31 = arith.constant 0 : index
    %38 = vector.load %arg5[%c1_28, %c0_29, %c0_30, %c0_31] : memref<2x3x32x32xbf16, #tpu.memory_space<vmem>>, vector<1x1x32x32xbf16>
    %39 = vector.shape_cast %38 : vector<1x1x32x32xbf16> to vector<32x32xbf16>
    %cst_32 = arith.constant dense<0.000000e+00> : vector<8x32xf32>
    %40 = tpu.matmul %37, %39, %cst_32 {dimension_numbers = #tpu.dot_dimension_numbers<[1], [0], [0], [1], [0, 0, 1, 1], [], []>} : vector<8x32xbf16>, vector<32x32xbf16>, vector<8x32xf32> -> vector<8x32xf32>
    %41 = vector.broadcast %36 : vector<1x32xf32> to vector<8x32xf32>
    %42 = arith.addf %41, %40 : vector<8x32xf32>
    %43 = vector.extract_strided_slice %34 {offsets = [3, 0], sizes = [8, 32], strides = [1, 1]} : vector<14x32xbf16> to vector<8x32xbf16>
    %c1_33 = arith.constant 1 : index
    %c1_34 = arith.constant 1 : index
    %c0_35 = arith.constant 0 : index
    %c0_36 = arith.constant 0 : index
    %44 = vector.load %arg5[%c1_33, %c1_34, %c0_35, %c0_36] : memref<2x3x32x32xbf16, #tpu.memory_space<vmem>>, vector<1x1x32x32xbf16>
    %45 = vector.shape_cast %44 : vector<1x1x32x32xbf16> to vector<32x32xbf16>
    %cst_37 = arith.constant dense<0.000000e+00> : vector<8x32xf32>
    %46 = tpu.matmul %43, %45, %cst_37 {dimension_numbers = #tpu.dot_dimension_numbers<[1], [0], [0], [1], [0, 0, 1, 1], [], []>} : vector<8x32xbf16>, vector<32x32xbf16>, vector<8x32xf32> -> vector<8x32xf32>
    %47 = arith.addf %42, %46 : vector<8x32xf32>
    %48 = vector.extract_strided_slice %34 {offsets = [6, 0], sizes = [8, 32], strides = [1, 1]} : vector<14x32xbf16> to vector<8x32xbf16>
    %c1_38 = arith.constant 1 : index
    %c2_39 = arith.constant 2 : index
    %c0_40 = arith.constant 0 : index
    %c0_41 = arith.constant 0 : index
    %49 = vector.load %arg5[%c1_38, %c2_39, %c0_40, %c0_41] : memref<2x3x32x32xbf16, #tpu.memory_space<vmem>>, vector<1x1x32x32xbf16>
    %50 = vector.shape_cast %49 : vector<1x1x32x32xbf16> to vector<32x32xbf16>
    %cst_42 = arith.constant dense<0.000000e+00> : vector<8x32xf32>
    %51 = tpu.matmul %48, %50, %cst_42 {dimension_numbers = #tpu.dot_dimension_numbers<[1], [0], [0], [1], [0, 0, 1, 1], [], []>} : vector<8x32xbf16>, vector<32x32xbf16>, vector<8x32xf32> -> vector<8x32xf32>
    %52 = arith.addf %47, %51 : vector<8x32xf32>
    %53 = vector.extract_strided_slice %30 {offsets = [3, 0], sizes = [8, 32], strides = [1, 1]} : vector<14x32xf32> to vector<8x32xf32>
    %54 = arith.addf %52, %53 : vector<8x32xf32>
    %c8_i32 = arith.constant 8 : i32
    %55 = arith.muli %arg1, %c8_i32 : i32
    %c14_i32 = arith.constant 14 : i32
    %56 = arith.subi %c14_i32, %55 : i32
    %57 = tpu.iota {dimensions = array<i32: 0>} : vector<8x32xi32>
    %58 = vector.broadcast %56 : i32 to vector<8x32xi32>
    %59 = arith.cmpi slt, %57, %58 : vector<8x32xi32>
    %cst_43 = arith.constant 0.000000e+00 : f32
    %60 = vector.broadcast %cst_43 : f32 to vector<8x32xf32>
    %61 = arith.select %59, %54, %60 : vector<8x32xi1>, vector<8x32xf32>
    %cst_44 = arith.constant dense<0.000000e+00> : vector<32xf32>
    %62 = vector.multi_reduction <add>, %61, %cst_44 [0] : vector<8x32xf32> to vector<32xf32>
    %63 = vector.shape_cast %62 : vector<32xf32> to vector<1x32xf32>
    %c0_45 = arith.constant 0 : index
    %c0_46 = arith.constant 0 : index
    %c0_47 = arith.constant 0 : index
    %c0_48 = arith.constant 0 : index
    %64 = vector.load %arg7[%c0_45, %c0_46, %c0_47, %c0_48] : memref<1x1x1x32xf32, #tpu.memory_space<vmem>>, vector<1x1x1x32xf32>
    %65 = vector.shape_cast %64 : vector<1x1x1x32xf32> to vector<1x32xf32>
    %66 = vector.shape_cast %63 : vector<1x32xf32> to vector<1x1x1x32xf32>
    tpu.vector_store %arg7[%c0_45, %c0_46, %c0_47, %c0_48], %66 {strides = array<i32>} : memref<1x1x1x32xf32, #tpu.memory_space<vmem>>, vector<1x1x1x32xf32>,
    return
  }
  func.func @transform_0(%arg0: i32, %arg1: i32) -> (i32, i32, i32, i32) {
    %c0_i32 = arith.constant 0 : i32
    %c0_i32_0 = arith.constant 0 : i32
    %c0_i32_1 = arith.constant 0 : i32
    return %arg0, %arg1, %c0_i32, %c0_i32_0 : i32, i32, i32, i32
  }
  func.func @transform_1(%arg0: i32, %arg1: i32) -> (i32, i32) {
    %c0_i32 = arith.constant 0 : i32
    %c0_i32_0 = arith.constant 0 : i32
    %c0_i32_1 = arith.constant 0 : i32
    return %c0_i32, %c0_i32_0 : i32, i32
  }
  func.func @transform_2(%arg0: i32, %arg1: i32) -> (i32, i32) {
    %c0_i32 = arith.constant 0 : i32
    %c0_i32_0 = arith.constant 0 : i32
    %c0_i32_1 = arith.constant 0 : i32
    return %c0_i32, %c0_i32_0 : i32, i32
  }
  func.func @transform_3(%arg0: i32, %arg1: i32) -> (i32, i32, i32, i32) {
    %c0_i32 = arith.constant 0 : i32
    %c0_i32_0 = arith.constant 0 : i32
    %c0_i32_1 = arith.constant 0 : i32
    %c0_i32_2 = arith.constant 0 : i32
    %c0_i32_3 = arith.constant 0 : i32
    return %c0_i32, %c0_i32_0, %c0_i32_1, %c0_i32_2 : i32, i32, i32, i32
  }
  func.func @transform_4(%arg0: i32, %arg1: i32) -> (i32, i32, i32) {
    %c0_i32 = arith.constant 0 : i32
    %c0_i32_0 = arith.constant 0 : i32
    %c0_i32_1 = arith.constant 0 : i32
    %c0_i32_2 = arith.constant 0 : i32
    return %c0_i32, %c0_i32_0, %c0_i32_1 : i32, i32, i32
  }
  func.func @transform_5(%arg0: i32, %arg1: i32) -> (i32, i32, i32, i32) {
    %c0_i32 = arith.constant 0 : i32
    %c0_i32_0 = arith.constant 0 : i32
    %c0_i32_1 = arith.constant 0 : i32
    return %arg0, %arg1, %c0_i32, %c0_i32_0 : i32, i32, i32, i32
  }
}

</mosaic_0001>

<bundles_post_ra>
// kernel: tpu_custom_call.1
= control target key start
LH: loop header
LB: loop body
LE: loop exit
PB: predicated region body
PF: predicated region fallthrough
CT: control target
= control target key end

     0   :  { %10 = vsyncpa [#allocation3], 0  ;;  %s1569_s0 = inlined_call_operand.vmem [shape: bf16[2,2,20,128], index: 0, kind: input, shape index: {}]   ;;  %s1570_s1 = inlined_call_operand.vmem [shape: bf16[128,32], index: 1, kind: input, shape index: {}]   ;;  %s1571_s2 = inlined_call_operand.vmem [shape: f32[1,32], index: 2, kind: input, shape index: {}]   ;;  %s1572_s3 = inlined_call_operand.vmem [shape: bf16[2,3,32,32], index: 3, kind: input, shape index: {}]   ;;  %s1573_s4 = inlined_call_operand.vmem [shape: f32[2,1,32], index: 4, kind: input, shape index: {}]   ;;  %s1574_s5 = inlined_call_operand.hbm [shape: f32[2,2,1,32], index: 5, kind: output, shape index: {}]  }
   0x1   :  { %12 = vsyncpa [#allocation3 + $0x1], 0  ;;  %s1324_s18 = smov 0   ;;  %s1326_s19 = smov 0  }
   0x2   :  { %s1328_s20 = smov 0   ;;  %s1330_s21 = smov 0  }
   0x3   :  { %s1332_s22 = smov 0   ;;  %s1334_s23 = smov 0  }
   0x4   :  { %s1336_s24 = smov 0   ;;  %s1338_s25 = smov 0  }
   0x5 LB: > { %1578 = sst [smem:[#allocation5_spill]] %s1285_s24  ;;  %s939_s26 = sadd.s32 4294967295, %s1289_s25   ;;  %s1289_s25 = sphi %s1338_s25, %s18_s25   ;;  %s1285_s24 = sphi %s1336_s24, %s1585_s24   ;;  %s1281_s23 = sphi %s1334_s23, %s1590_s23   ;;  %s1277_s22 = sphi %s1332_s22, %s1583_s22   ;;  %s1273_s21 = sphi %s1330_s21, %s1589_s21   ;;  %s1269_s20 = sphi %s1328_s20, %s1588_s20   ;;  %s1265_s19 = sphi %s1326_s19, %s1587_s19   ;;  %s1261_s18 = sphi %s1324_s18, %s1586_s18  }
   0x6   : > { %s940_s27 = sadd.s32 4294967294, %s1289_s25   ;;  %s27_s28 = sadd.s32 1, %s1281_s23 }
   0x7   : > { %p28_p0 = scmp.ge.s32.totalorder %s27_s28, 2  ;;  %s30_s29 = sadd.s32 1, %s1285_s24 }
   0x8   : > { %p161_p1 = scmp.ne.s32.totalorder %s1269_s20, %s1265_s19  ;;  %p162_p2 = scmp.eq.s32.totalorder %s939_s26, 3 }
   0x9   : > { %s1592_s28 = smov (%p28_p0, %s27_s28), 0  ;;  %s1594_s29 = smov (!%p28_p0, %s30_s29), %s1285_s24 }
   0xa   : > { %1579 = sst [smem:[#allocation6_spill]] %s1592_s28  ;;  %s147_s30 = ssub.s32 %s1281_s23, %s1592_s28 }
   0xb   : > { %p1375_p3 = por %p162_p2, %p161_p1  ;;  %p32_p4 = scmp.ge.s32.totalorder %s1594_s29, 2 }
   0xc   : > { %p167_p5 = scmp.ne.s32.totalorder %s1265_s19, %s1261_s18  ;;  %p168_p6 = scmp.eq.s32.totalorder %s940_s27, 3 }
   0xd   : > { %p943_p7 = scmp.ge.s32.totalorder %s1289_s25, 1  ;;  %s1596_s29 = smov (%p32_p4, %s1594_s29), 0 }
   0xe   : > { %1581 = sst [smem:[#allocation7_spill]] %s1596_s29  ;;  %p1384_p8 = por %p168_p6, %p167_p5 }
   0xf   : > { %p210_p9 = scmp.lt.s32.totalorder %s1289_s25, 5  ;;  %s146_s8 = ssub.s32 %s1285_s24, %s1596_s29 }
  0x10   : > { %s151_s9 = sadd.s32 1, %s1269_s20  ;;  %s148_s10 = sor.u32 %s147_s30, %s146_s8 }
  0x11   : > { %p211_p10 = pnand %p943_p7, %p210_p9  ;;  %p149_p11 = scmp.eq.s32.totalorder %s148_s10, 0 }
  0x12   : > { %v1173_v0 = vld [vmem:[%s1570_s1] sm:$0xff] (!%p211_p10)   ;;  %p241_p12 = scmp.lt.s32.totalorder (!%p211_p10), %s1277_s22, 1  ;;  %v1174_v1 = vld [vmem:[%s1570_s1 + $0x8] sm:$0xff] (!%p211_p10)   ;;  %p243_p13 = scmp.lt.s32.totalorder (!%p211_p10), %s1273_s21, 1  ;;  %v1175_v2 = vld [vmem:[%s1570_s1 + $0x10] sm:$0xff] (!%p211_p10)   ;;  %v1291_v11 = vmov (!%p211_p10), 0.0  }
  0x13   : > { %s1393_s11 = scalar_select %p149_p11, %s1269_s20, %s151_s9  }
  0x14   : > { %214 = sbr.rel (%p211_p10) target bundleno = 767 (0x2ff), region = 40  ;;  %1030 = vmatprep.subr.bf16.mxu0 (!%p211_p10), %v1173_v0  ;;  %v1176_v3 = vld [vmem:[%s1570_s1 + $0x18] sm:$0xff] (!%p211_p10)   ;;  %v1177_v5 = vld [vmem:[%s1570_s1 + $0x20] sm:$0xff] (!%p211_p10)   ;;  %v1178_v6 = vld [vmem:[%s1570_s1 + $0x28] sm:$0xff] (!%p211_p10)   ;;  %1050 = vmatprep.subr.bf16.mxu1 (!%p211_p10), %v1291_v11  ;;  %vm1292_vm0 = vmmov (!%p211_p10), 0   ;;  %vm544_vm1 = vcmask (!%p211_p10), 1044480  }
  0x15   : > { %1031 = vmatpush3.bf16.msra.mxu0 (!%p211_p10), %v1173_v0  ;;  %v1179_v7 = vld [vmem:[%s1570_s1 + $0x30] sm:$0xff] (!%p211_p10)   ;;  %v1180_v8 = vld [vmem:[%s1570_s1 + $0x38] sm:$0xff] (!%p211_p10)   ;;  %v1183_v10 = vld [vmem:[%s1572_s3] sm:$0xff] (!%p211_p10)   ;;  %1054 = vmatprep.mubr.msk.bf16.mxu1 (!%p211_p10), %vm1292_vm0, %v1291_v11  ;;  %vm408_vm2 = vcmask (!%p211_p10), 261120   ;;  %vm466_vm3 = vsmask.f32 (!%p211_p10), 6400 }
  0x16   : > { %1032 = vmatprep.subr.bf16.mxu0 (!%p211_p10), %v1174_v1  ;;  %1051 = vmatpush3.bf16.msra.mxu1 (!%p211_p10), %v1183_v10  ;;  %v1184_v12 = vld [vmem:[%s1572_s3 + $0x8] sm:$0xff] (!%p211_p10)   ;;  %v945_v13 = vld [vmem:[%s1571_s2] ss:$0 sm:$0xff] (!%p211_p10)  ;;  %v1185_v33 = vld [vmem:[%s1572_s3 + $0x10] sm:$0xff] (!%p211_p10)   ;;  %s998_s10 = sshll.u32 (!%p211_p10), %s1277_s22, 1  ;;  %vm845_vm5 = vcmask (!%p211_p10), 253952  }
  0x17   : > { %1052 = vmatprep.subr.bf16.mxu1 (!%p211_p10), %v1291_v11  ;;  %v1186_v40 = vld [vmem:[%s1572_s3 + $0x18] sm:$0xff] (!%p211_p10)   ;;  %v1187_v46 = vld [vmem:[%s1572_s3 + $0x20] sm:$0xff] (!%p211_p10)   ;;  %v1188_v48 = vld [vmem:[%s1572_s3 + $0x28] sm:$0xff] (!%p211_p10)   ;;  %s1293_s26 = smov (!%p211_p10), [#allocation2]  }
  0x18   : > { %v1189_v49 = vld [vmem:[%s1572_s3 + $0x30] sm:$0xff] (!%p211_p10)   ;;  %v1190_v50 = vld [vmem:[%s1572_s3 + $0x38] sm:$0xff] (!%p211_p10)   ;;  %v1191_v51 = vld [vmem:[%s1572_s3 + $0x40] sm:$0xff] (!%p211_p10)   ;;  %s1199_s27 = sshll.u32 (!%p211_p10), %s1293_s26, 4  ;;  %s1200_s27 = int_to_ptr.vmem [resolvable:$false] %s1199_s27 }
  0x19   : > { %1033 = vmatpush3.bf16.msra.mxu0 (!%p211_p10), %v1174_v1  ;;  %v1193_v52 = vld [vmem:[%s1572_s3 + $0x48] sm:$0xff] (!%p211_p10)   ;;  %v959_v57 = vld [vmem:[%s1573_s4] ss:$0 sm:$0xff] (!%p211_p10) }
  0x1a   : > { %1034 = vmatprep.subr.bf16.mxu0 (!%p211_p10), %v1175_v2  ;;  %1053 = vmatpush3.bf16.msra.mxu1 (!%p211_p10), %v1184_v12 }
  0x1b   : > { %s242_s16 = scalar_select %p241_p12, %s1277_s22, 1  ;;  %1058 = vmatprep.subr.bf16.mxu1 %v1291_v11 }
  0x1c   : > { %s244_s17 = scalar_select %p243_p13, %s1273_s21, 1 }
  0x1d   : > { %s1099_s30 = smul.u32 6, %s242_s16  ;;  %1035 = vmatpush3.bf16.msra.mxu0 %v1175_v2 }
  0x1e   : > { %s1098_s8 = smul.u32 3, %s244_s17  ;;  %1036 = vmatprep.subr.bf16.mxu0 %v1176_v3 }
  0x20   : > { %s247_s9 = sadd.s32 %s1099_s30, %s1098_s8  ;;  %s997_s30 = sshll.u32 %s1273_s21, 3 }
  0x21   : > { %s944_s13 = sshll.u32 %s247_s9, 2  ;;  %1037 = vmatpush3.bf16.msra.mxu0 %v1176_v3  ;;  %s832_s28 = ssub.s32 14, %s997_s30 }
  0x22   : > { %s249_s29 = scalar_lea.vmem %s1569_s0, %s944_s13  ;;  %1038 = vmatprep.subr.bf16.mxu0 %v1177_v5  ;;  %s239_s9 = sand.u32 1, %s1265_s19  }
  0x23   : > { %v1181_v4 = vld [vmem:[%s249_s29] sm:$0xff]   ;;  %v1182_v9 = vld [vmem:[%s249_s29 + $0x8] ss:$0 sps:$4 sm:$0x33]   ;;  %s858_s29 = sadd.s32 %s1273_s21, %s998_s10  ;;  %s240_s13 = scalar_lea.vmem [#allocation2], %s239_s9 }
  0x24   : > { %1046 = vmatprep.mubr.bf16.mxu0 %v1181_v4  ;;  %s999_s12 = sshll.u32 %s858_s29, 4  ;;  %s862_s14 = sshll.u32 %s240_s13, 4  ;;  %s1518_s14 = int_to_ptr.vmem [resolvable:$true] %s862_s14 }
  0x25   : > { %1039 = vmatpush3.bf16.msra.mxu0 %v1177_v5  ;;  %s1516_s17 = scalar_lea.hbm %s1574_s5, %s999_s12  ;;  %s848_s22 = scalar_lea.sflag [#allocation3], %s239_s9 }
  0x26   : > { %1040 = vmatprep.subr.bf16.mxu0 %v1178_v6  ;;  %s1195_s21 = scalar_lea.vmem %s1518_s14, 16  ;;  %s1201_s30 = scalar_lea.vmem %s1200_s27, 32 }
  0x27   : > { %p1196_p0 = scmp.ne.s32.totalorder %s1518_s14, %s1195_s21  ;;  %p1202_p4 = scmp.lt.s32.totalorder %s1518_s14, %s1200_s27 }
  0x28   : > { %p1203_p5 = scmp.lt.s32.totalorder %s1201_s30, %s1195_s21 }
  0x29   : > { %1041 = vmatpush3.bf16.msra.mxu0 %v1178_v6  ;;  %p1197_p1 = pnand %p1196_p0, %p1375_p3 }
  0x2a   : > { %1042 = vmatprep.subr.bf16.mxu0 %v1179_v7  ;;  %p1204_p6 = por %p1203_p5, %p1202_p4 }
  0x2b   : > { %p1198_p2 = pneg %p1197_p1 }
  0x2d   : > { %1043 = vmatpush3.bf16.msra.mxu0 %v1179_v7  ;;  %p1205_p7 = pnand %p1204_p6, %p1198_p2 }
  0x2e   : > { %1044 = vmatprep.subr.bf16.mxu0 %v1180_v8 }
  0x31   : > { %1045 = vmatpush3.bf16.msra.mxu0 %v1180_v8 }
  0x32   : > { %1082 = vmatprep.subr.bf16.mxu0 %v1291_v11 }
  0x34   : > { %1047 = vmatmul.mubr.bf16.vlgmr.msra.gmra.mrb[0].mxu0 %v1182_v9 }
  0x35   : > { %1086 = vmatprep.mubr.msk.bf16.mxu0 %vm1292_vm0, %v1291_v11  ;;  %1083 = vmatpush3.bf16.msra.mxu0 %v1191_v51 }
  0x36   : > { %1084 = vmatprep.subr.bf16.mxu0 %v1291_v11 }
  0x39   : > { %1085 = vmatpush3.bf16.msra.mxu0 %v1193_v52 }
 0x107   : > { %v1048_v14 = vpop.f32.mrb[0].mxu0 }
 0x108   : > { %v378_v15 = vadd.f32 %v1048_v14, %v945_v13  ;;  %v369_v16 = vpop.f32.mrb[1].mxu0 }
 0x109   : > { %v370_v17 = vadd.f32 %v945_v13, %v369_v16  ;;  %v1049_v18 = vpop.f32.mrb[2].mxu0 }
 0x10a   : > { %v385_v19 = vmul.f32 0.1, %v378_v15  ;;  %v372_v20 = vpop.f32.mrb[3].mxu0  ;;  %v613_v24 = vrot.slane %v378_v15, 3  ;;  %v1192_v18 = vld [vmem:[%s1572_s3 + $0x50] sm:$0xff]  }
 0x10b   : > { %v383_v21 = vmul.f32 0.1, %v370_v17  ;;  %v373_v22 = vadd.f32 %v945_v13, %v372_v20  ;;  %v610_v25 = vrot.slane %v370_v17, 3 }
 0x10c   : > { %v388_v23 = vmax.f32 %v378_v15, %v385_v19 }
 0x10d   : > { %v384_v26 = vmul.f32 0.1, %v373_v22  ;;  %v611_v27 = vrot.slane %v373_v22, 3  ;;  %v386_v29 = vmax.f32 %v370_v17, %v383_v21 }
 0x10e   : > { %v390_v28 = vpack.c.bf16 %v388_v23, %v388_v23 }
 0x10f   : > { %v387_v30 = vmax.f32 %v373_v22, %v384_v26  ;;  %v612_v31 = vsel %vm544_vm1, %v610_v25, %v611_v27  ;;  %v1445_v32 = vsel %vm544_vm1, %v611_v27, %v613_v24  ;;  %v1194_v22 = vld [vmem:[%s1572_s3 + $0x58] sm:$0xff]  }
 0x110   : > { %v475_v35 = vshll.u32 %v390_v28, 16  ;;  %v546_v36 = vrot.slane %v390_v28, 3 }
 0x111   : > { %v389_v34 = vpack.c.bf16 %v387_v30, %v386_v29  ;;  %v982_v29 = vld [vmem:[%s1573_s4 + $0x1] ss:$0 sm:$0xff] }
 0x112   : > { %v477_v44 = vrot.slane %v475_v35, 2 }
 0x113   : > { %1055 = vmatmul.mubr.msk.bf16.vlgmr.msra.gmra.mrb[0].mxu1 %vm408_vm2, %v389_v34  ;;  %v467_v37 = vshrl.u32 %v389_v34, 16  ;;  %v470_v38 = vshll.u32 %v389_v34, 16  ;;  %v545_v39 = vrot.slane %v389_v34, 3 }
 0x114   : > { %1059 = vmatpush3.bf16.msra.mxu1 %v1185_v33  ;;  %1062 = vmatprep.mubr.msk.bf16.mxu1 %vm1292_vm0, %v1291_v11 }
 0x115   : > { %1060 = vmatprep.subr.bf16.mxu1 %v1291_v11  ;;  %v469_v41 = vrot.slane %v467_v37, 1  ;;  %v472_v42 = vrot.slane %v470_v38, 2  ;;  %v547_v43 = vsel %vm544_vm1, %v545_v39, %v546_v36  ;;  %v835_v37 = vstv %s832_s28 }
 0x117   : > { %v473_v45 = vor.u32 %v472_v42, %v469_v41 }
 0x118   : > { %1061 = vmatpush3.bf16.msra.mxu1 %v1186_v40 }
 0x119   : > { %1066 = vmatprep.subr.bf16.mxu1 %v1291_v11  ;;  %v478_v47 = vsel %vm466_vm3, %v473_v45, %v477_v44 }
 0x11b   : > { %1063 = vmatmul.mubr.msk.bf16.vlgmr.msra.gmra.mrb[4].mxu1 %vm408_vm2, %v478_v47 }
 0x11c   : > { %1067 = vmatpush3.bf16.msra.mxu1 %v1187_v46  ;;  %1070 = vmatprep.mubr.msk.bf16.mxu1 %vm1292_vm0, %v1291_v11 }
 0x11d   : > { %1068 = vmatprep.subr.bf16.mxu1 %v1291_v11 }
 0x120   : > { %1069 = vmatpush3.bf16.msra.mxu1 %v1188_v48 }
 0x121   : > { %1074 = vmatprep.subr.bf16.mxu1 %v1291_v11 }
 0x123   : > { %1071 = vmatmul.mubr.msk.bf16.vlgmr.msra.gmra.mrb[8].mxu1 %vm408_vm2, %v547_v43 }
 0x124   : > { %1078 = vmatprep.mubr.msk.bf16.mxu1 %vm1292_vm0, %v1291_v11  ;;  %1075 = vmatpush3.bf16.msra.mxu1 %v1189_v49 }
 0x125   : > { %1076 = vmatprep.subr.bf16.mxu1 %v1291_v11 }
 0x128   : > { %1077 = vmatpush3.bf16.msra.mxu1 %v1190_v50 }
 0x129   : > { %1090 = vmatprep.subr.bf16.mxu1 %v1291_v11 }
 0x1e6   : > { %v446_v53 = vpop.f32.mrb[0].mxu1 }
 0x1e7   : > { %v1056_v54 = vpop.f32.mrb[1].mxu1  ;;  %v459_v58 = vadd.f32 %v959_v57, %v446_v53 }
 0x1e8   : > { %v449_v55 = vpop.f32.mrb[2].mxu1 }
 0x1e9   : > { %v1057_v56 = vpop.f32.mrb[3].mxu1  ;;  %v460_v60 = vadd.f32 %v959_v57, %v449_v55 }
 0x1ee   : > { %v528_v59 = vpop.f32.mrb[4].mxu1 }
 0x1ef   : > { %v535_v61 = vadd.f32 %v528_v59, %v459_v58  ;;  %v1064_v62 = vpop.f32.mrb[5].mxu1 }
 0x1f0   : > { %v531_v63 = vpop.f32.mrb[6].mxu1 }
 0x1f1   : > { %v536_v0 = vadd.f32 %v531_v63, %v460_v60  ;;  %v1065_v1 = vpop.f32.mrb[7].mxu1 }
 0x1f6   : > { %v597_v2 = vpop.f32.mrb[8].mxu1 }
 0x1f7   : > { %v604_v3 = vadd.f32 %v597_v2, %v535_v61  ;;  %v1072_v4 = vpop.f32.mrb[9].mxu1 }
 0x1f8   : > { %v600_v5 = vpop.f32.mrb[10].mxu1 }
 0x1f9   : > { %v617_v6 = vadd.f32 %v612_v31, %v604_v3  ;;  %v605_v7 = vadd.f32 %v600_v5, %v536_v0  ;;  %v1073_v8 = vpop.f32.mrb[11].mxu1  ;;  %v833_v31 = vlaneseq }
 0x1fb   : > { %v619_v9 = vmul.f32 0.1, %v617_v6  ;;  %v618_v10 = vadd.f32 %v1445_v32, %v605_v7  ;;  %v826_v12 = vrot.slane %v617_v6, 3  ;;  %v834_v34 = vshrl.u32 %v833_v31, 7 }
 0x1fd   : > { %v620_v13 = vmul.f32 0.1, %v618_v10  ;;  %v827_v14 = vrot.slane %v618_v10, 3  ;;  %v621_v15 = vmax.f32 %v617_v6, %v619_v9  ;;  %vm836_vm4 = vcmp.lt.s32.totalorder %v834_v34, %v835_v37 }
 0x1ff   : > { %v622_v16 = vmax.f32 %v618_v10, %v620_v13  ;;  %v828_v17 = vsel %vm544_vm1, %v826_v12, %v827_v14 }
 0x201   : > { %v623_v19 = vpack.c.bf16 %v622_v16, %v621_v15 }
 0x203   : > { %1079 = vmatmul.mubr.msk.bf16.vlgmr.msra.gmra.mrb[12].mxu1 %vm408_vm2, %v623_v19  ;;  %v698_v20 = vshrl.u32 %v623_v19, 16  ;;  %v701_v21 = vshll.u32 %v623_v19, 16  ;;  %v767_v26 = vrot.slane %v623_v19, 3 }
 0x204   : > { %1091 = vmatpush3.bf16.msra.mxu1 %v1192_v18  ;;  %1094 = vmatprep.mubr.msk.bf16.mxu1 %vm1292_vm0, %v1291_v11 }
 0x205   : > { %1092 = vmatprep.subr.bf16.mxu1 %v1291_v11  ;;  %v700_v23 = vrot.slane %v698_v20, 1  ;;  %v703_v24 = vrot.slane %v701_v21, 2 }
 0x207   : > { %v704_v25 = vor.u32 %v703_v24, %v700_v23 }
 0x208   : > { %1093 = vmatpush3.bf16.msra.mxu1 %v1194_v22 }
 0x209   : > { %1087 = vmatmul.mubr.msk.bf16.vlgmr.msra.gmra.mrb[4].mxu0 %vm408_vm2, %v704_v25 }
 0x20b   : > { %1095 = vmatmul.mubr.msk.bf16.vlgmr.msra.gmra.mrb[16].mxu1 %vm408_vm2, %v767_v26 }
 0x2d6   : > { %v680_v27 = vpop.f32.mrb[12].mxu1 }
 0x2d7   : > { %v1080_v28 = vpop.f32.mrb[13].mxu1  ;;  %v692_v11 = vadd.f32 %v982_v29, %v680_v27 }
 0x2d8   : > { %v683_v30 = vpop.f32.mrb[14].mxu1 }
 0x2d9   : > { %v1081_v32 = vpop.f32.mrb[15].mxu1 }
 0x2dc   : > { %v754_v33 = vpop.f32.mrb[4].mxu0 }
 0x2dd   : > { %v760_v35 = vadd.f32 %v754_v33, %v692_v11  ;;  %v1088_v36 = vpop.f32.mrb[5].mxu0 }
 0x2de   : > { %v757_v38 = vpop.f32.mrb[6].mxu0  ;;  %v817_v39 = vpop.f32.mrb[16].mxu1 }
 0x2df   : > { %v823_v40 = vadd.f32 %v817_v39, %v760_v35  ;;  %v1089_v41 = vpop.f32.mrb[7].mxu0  ;;  %v1096_v42 = vpop.f32.mrb[17].mxu1 }
 0x2e0   : > { %v820_v43 = vpop.f32.mrb[18].mxu1 }
 0x2e1   : > { %v830_v44 = vadd.f32 %v828_v17, %v823_v40  ;;  %v1097_v45 = vpop.f32.mrb[19].mxu1 }
 0x2e3   : > { %v837_v46 = vsel %vm836_vm4, %v830_v44, 0.0 }
 0x2e4   : > { %v838_v47 = vsel %vm408_vm2, %v837_v46, 0.0 }
 0x2e5   : > { %v839_v48 = vrot.slane %v838_v47, 4 }
 0x2e7   : > { %v840_v49 = vadd.f32 %v839_v48, %v838_v47 }
 0x2e9   : > { %v841_v50 = vrot.slane %v840_v49, 2 }
 0x2eb   : > { %v842_v51 = vadd.f32 %v841_v50, %v840_v49 }
 0x2ed   : > { %v843_v52 = vrot.slane %v842_v51, 1 }
 0x2ef   : > { %v844_v53 = vadd.f32 %v843_v52, %v842_v51 }
 0x2f1   : > { %846 = vst.msk [vmem:[%s240_s13] sm:$0x1] %vm845_vm5, %v844_v53 }
 0x2f2   : > { %1208 = shalt.err (!%p1205_p7)
}
 0x2f3   : > { %s1209_s8 = scalar_lea.hbm %s1516_s17, 16  ;;  %s1213_s9 = scalar_lea.hbm %s1574_s5, 64 }
 0x2f4   : > { %p1210_p9 = scmp.ne.s32.totalorder %s1516_s17, %s1209_s8  ;;  %p1214_p12 = scmp.lt.u32.totalorder %s1516_s17, %s1574_s5 }
 0x2f5   : > { %p1215_p13 = scmp.lt.u32.totalorder %s1213_s9, %s1209_s8  ;;  %p1217_p1 = scmp.lt.u32.totalorder %s1209_s8, %s1516_s17 }
 0x2f6   : > { %p1211_p10 = pnand %p1210_p9, %p1375_p3 }
 0x2f7   : > { %p1216_p0 = por %p1215_p13, %p1214_p12 }
 0x2f8   : > { %p1212_p11 = pneg %p1211_p10 }
 0x2f9   : > { %p1218_p2 = por %p1217_p1, %p1216_p0 }
 0x2fb   : > { %p1219_p4 = pnand %p1218_p2, %p1212_p11 }
 0x2fd   : > { %1222 = shalt.err (!%p1219_p4)
}
 0x2fe   : > { %1100 = dma.vmem_to_hbm [thread:$0]  (%p1375_p3), %s1518_s14, 16, %s1516_s17, %s848_s22  }
 0x2ff PF: > { %p1106_p5 = scmp.ge.s32.totalorder %s1289_s25, 2  ;;  %s874_s12 = sand.u32 1, %s1261_s18  }
 0x300   : > { %s875_s13 = scalar_lea.sflag [#allocation3], %s874_s12 }
 0x301   : > { %p1103_p6 = pnand %p1106_p5, %p1384_p8 }
 0x303   : > { %1256 = dma.done.wait (!%p1103_p6), %s875_s13, 16  }
 0x304   : > { %1258 = vsyncadd (!%p1103_p6), %s875_s13, 4294967280  ;;  %s18_s25 = sadd.s32 1, %s1289_s25   ;;  %s1583_s22 = sld [smem:[#allocation5_spill]] }
 0x305   : > { %p15_p7 = scmp.ge.s32.totalorder %s18_s25, 6   ;;  %s1584_s6 = sld [smem:[#allocation6_spill]] }
 0x306   : > { %s1585_s24 = sld [smem:[#allocation7_spill]]  ;;  %s1586_s18 = smov %s1265_s19 }
 0x307   : > { %s1587_s19 = smov %s1269_s20  ;;  %s1588_s20 = smov %s1393_s11 }
 0x308   : > { %s1589_s21 = smov %s1281_s23  ;;  %17 = sbr.rel (!%p15_p7) target bundleno = 5 (0x5), region = 81 }
 0x30b   : > { %s1590_s23 = smov %s1584_s6 }
 0x30f   :  { %879 = vsyncpa [#allocation3], 1 }
 0x310   :  { %881 = vsyncpa [#allocation3 + $0x1], 1 }

</bundles_post_ra>
